<compile_context>
chip_gen: v7x
topology: tpu7x:2x2x1
jax: 0.10.0
libtpu: 0.0.40
codegen_flags: <defaults>
</compile_context>

<pallas_src>
import jax
import jax.numpy as jnp
from jax.experimental import pallas as pl
from jax.experimental.pallas import tpu as pltpu

HIDDEN = 300          # logical hidden width (PyTorch module)
H_PAD = 384           # padded hidden width: 3 * 128 lanes
EPS = 1e-5

# Row layout of the packed (8, H_PAD) parameter-row array.
ROW_G1, ROW_BETA1, ROW_G2, ROW_BETA2, ROW_W3, ROW_B3 = 0, 1, 2, 3, 4, 5


def linearnet_kernel(x_ref, w1_ref, w2_ref, rows_ref, o_ref):
    inv_b = jnp.float32(1.0 / x_ref.shape[0])

    rows = rows_ref[...]                      # (8, H_PAD) f32, one DMA
    g1, be1 = rows[ROW_G1:ROW_G1 + 1], rows[ROW_BETA1:ROW_BETA1 + 1]
    g2, be2 = rows[ROW_G2:ROW_G2 + 1], rows[ROW_BETA2:ROW_BETA2 + 1]
    w3_row = rows[ROW_W3:ROW_W3 + 1]          # (1, H_PAD)
    b3 = rows[ROW_B3:ROW_B3 + 1, 0:1]         # (1, 1) scalar bias

    def bn_relu(h, gamma, beta):
        # Single reduction pass: sum and sum-of-squares together.
        s1 = jnp.sum(h, axis=0, keepdims=True)
        s2 = jnp.sum(h * h, axis=0, keepdims=True)
        mu = s1 * inv_b
        var = jnp.maximum(s2 * inv_b - mu * mu, 0.0)      # biased variance
        scale = gamma * jax.lax.rsqrt(var + EPS)          # (1, H_PAD) row only
        shift = beta - mu * scale
        return jnp.maximum(h * scale + shift, 0.0)

    # ---- fc1 + bn1 + relu (pre-BN bias cancels -> omitted) ------------------
    h = jnp.dot(x_ref[...].astype(jnp.bfloat16), w1_ref[...],
                preferred_element_type=jnp.float32)
    h = bn_relu(h, g1, be1)

    # ---- fc2 + bn2 + relu (pre-BN bias cancels -> omitted) ------------------
    h = jnp.dot(h.astype(jnp.bfloat16), w2_ref[...],
                preferred_element_type=jnp.float32)
    h = bn_relu(h, g2, be2)

    # ---- fc3: VPU multiply + lane reduce (no padded-zero weight DMA) --------
    out = jnp.sum(h * w3_row, axis=-1, keepdims=True) + b3
    o_ref[...] = out.astype(o_ref.dtype)


def linearnet_forward(x, params):
    """x: (B, in_size) float32 -> (B, 1) float32."""
    B = x.shape[0]
    args = (x, params["w1"], params["w2"], params["rows"])
    # No grid: whole-array VMEM blocks, no pipelining scaffolding needed at
    # this size.
    vmem_spec = pl.BlockSpec(memory_space=pltpu.MemorySpace.VMEM)
    out = pl.pallas_call(
        linearnet_kernel,
        out_shape=jax.ShapeDtypeStruct((B, 1), jnp.float32),
        in_specs=[vmem_spec] * len(args),
        out_specs=vmem_spec,
    )(*args)
    return out


def _pad2(a, shape):
    out = jnp.zeros(shape, a.dtype)
    return out.at[:a.shape[0], :a.shape[1]].set(a)


def init_params(key, in_size):
    """Xavier-uniform weights (matching torch.nn.init.xavier_uniform_ on the
    original shapes), zero biases, ones/zeros BN.  Returns
    (packed/padded kernel params, unpadded f32 reference params)."""
    k1, k2, k3 = jax.random.split(key, 3)

    def xavier(k, fan_in, fan_out):
        bound = jnp.sqrt(6.0 / (fan_in + fan_out))
        # stored as (in_features, out_features)
        return jax.random.uniform(k, (fan_in, fan_out), jnp.float32,
                                  minval=-bound, maxval=bound)

    w1 = xavier(k1, in_size, HIDDEN)
    w2 = xavier(k2, HIDDEN, HIDDEN)
    w3 = xavier(k3, HIDDEN, 1)

    f32_params = {
        "w1": w1, "b1": jnp.zeros((1, HIDDEN), jnp.float32),
        "g1": jnp.ones((1, HIDDEN), jnp.float32),
        "beta1": jnp.zeros((1, HIDDEN), jnp.float32),
        "w2": w2, "b2": jnp.zeros((1, HIDDEN), jnp.float32),
        "g2": jnp.ones((1, HIDDEN), jnp.float32),
        "beta2": jnp.zeros((1, HIDDEN), jnp.float32),
        "w3": w3, "b3": jnp.zeros((1, 1), jnp.float32),
    }

    # Padded bf16 matmul weights.  Zero-padded rows/cols keep the padded
    # lanes inert through every matmul; gamma is zero-padded so padded
    # columns stay exactly 0 through BN; w3 row is zero-padded so they never
    # reach the output.
    w3_row = jnp.zeros((H_PAD,), jnp.float32).at[:HIDDEN].set(
        w3[:, 0].astype(jnp.bfloat16).astype(jnp.float32))
    rows = jnp.zeros((8, H_PAD), jnp.float32)
    rows = rows.at[ROW_G1, :HIDDEN].set(1.0)      # gamma1
    rows = rows.at[ROW_G2, :HIDDEN].set(1.0)      # gamma2
    rows = rows.at[ROW_W3].set(w3_row)            # fc3 weight row
    # beta1/beta2 rows and b3 scalar stay zero (their init values).

    kernel_params = {
        "w1": _pad2(w1, (in_size, H_PAD)).astype(jnp.bfloat16),
        "w2": _pad2(w2, (H_PAD, H_PAD)).astype(jnp.bfloat16),
        "rows": rows,
    }
    return kernel_params, f32_params


def _bn_relu_ref(h, gamma, beta):
    mu = h.mean(0, keepdims=True)
    var = ((h - mu) ** 2).mean(0, keepdims=True)
    return jnp.maximum((h - mu) * jax.lax.rsqrt(var + EPS) * gamma + beta, 0.0)


def reference_forward_bf16(x, kp):
    """Pure-JAX reference matching the kernel's numerics (bf16 weights,
    f32 accumulation, packed parameter rows, no pre-BN bias)."""
    rows = kp["rows"]

    def mm(a, w):
        return jnp.dot(a.astype(jnp.bfloat16), w,
                       preferred_element_type=jnp.float32)

    h = _bn_relu_ref(mm(x, kp["w1"]),
                     rows[ROW_G1:ROW_G1 + 1], rows[ROW_BETA1:ROW_BETA1 + 1])
    h = _bn_relu_ref(mm(h, kp["w2"]),
                     rows[ROW_G2:ROW_G2 + 1], rows[ROW_BETA2:ROW_BETA2 + 1])
    return (jnp.sum(h * rows[ROW_W3:ROW_W3 + 1], axis=-1, keepdims=True)
            + rows[ROW_B3, 0])


def reference_forward_f32(x, p):
    """Pure-JAX f32 reference of the original PyTorch module semantics."""
    h = _bn_relu_ref(x @ p["w1"] + p["b1"], p["g1"], p["beta1"])
    h = _bn_relu_ref(h @ p["w2"] + p["b2"], p["g2"], p["beta2"])
    return h @ p["w3"] + p["b3"]


if __name__ == "__main__":
    key = jax.random.PRNGKey(0)
    kx, kp = jax.random.split(key)

    B, IN_SIZE = 8, 16
    x = jax.random.normal(kx, (B, IN_SIZE), jnp.float32)
    kernel_params, f32_params = init_params(kp, IN_SIZE)

    out = linearnet_forward(x, kernel_params)
    out = jax.block_until_ready(out)
    assert out.shape == (B, 1)

    # Tight check vs a reference with identical (bf16-weight) numerics.
    ref_bf16 = reference_forward_bf16(x, kernel_params)
    assert jnp.allclose(out, ref_bf16, atol=2e-3, rtol=2e-3)

    # Looser semantic check vs the full-f32 PyTorch-math reference
    # (bf16 weights introduce ~1e-2-level differences).
    ref_f32 = reference_forward_f32(x, f32_params)
    assert jnp.allclose(out, ref_f32, atol=5e-2, rtol=5e-2)

    print("KERNEL_OK")
</pallas_src>

<mosaic_0001>
module attributes {stable_mosaic.version = 11 : i64} {
  func.func @linearnet_kernel(%arg0: memref<8x16xf32, #tpu.memory_space<vmem>>, %arg1: memref<16x384xbf16, #tpu.memory_space<vmem>>, %arg2: memref<384x384xbf16, #tpu.memory_space<vmem>>, %arg3: memref<8x384xf32, #tpu.memory_space<vmem>>, %arg4: memref<8x1xf32, #tpu.memory_space<vmem>>) attributes {dimension_semantics = [], scalar_prefetch = 0 : i64, scratch_operands = 0 : i64, tpu.core_type = #tpu.core_type<tc>} {
    %c0 = arith.constant 0 : index
    %c0_0 = arith.constant 0 : index
    %0 = vector.load %arg3[%c0, %c0_0] : memref<8x384xf32, #tpu.memory_space<vmem>>, vector<8x384xf32>
    %1 = vector.extract_strided_slice %0 {offsets = [0, 0], sizes = [1, 384], strides = [1, 1]} : vector<8x384xf32> to vector<1x384xf32>
    %2 = vector.extract_strided_slice %0 {offsets = [1, 0], sizes = [1, 384], strides = [1, 1]} : vector<8x384xf32> to vector<1x384xf32>
    %3 = vector.extract_strided_slice %0 {offsets = [2, 0], sizes = [1, 384], strides = [1, 1]} : vector<8x384xf32> to vector<1x384xf32>
    %4 = vector.extract_strided_slice %0 {offsets = [3, 0], sizes = [1, 384], strides = [1, 1]} : vector<8x384xf32> to vector<1x384xf32>
    %5 = vector.extract_strided_slice %0 {offsets = [4, 0], sizes = [1, 384], strides = [1, 1]} : vector<8x384xf32> to vector<1x384xf32>
    %6 = vector.extract_strided_slice %0 {offsets = [5, 0], sizes = [1, 1], strides = [1, 1]} : vector<8x384xf32> to vector<1x1xf32>
    %c0_1 = arith.constant 0 : index
    %c0_2 = arith.constant 0 : index
    %7 = vector.load %arg0[%c0_1, %c0_2] : memref<8x16xf32, #tpu.memory_space<vmem>>, vector<8x16xf32>
    %8 = arith.truncf %7 : vector<8x16xf32> to vector<8x16xbf16>
    %c0_3 = arith.constant 0 : index
    %c0_4 = arith.constant 0 : index
    %9 = vector.load %arg1[%c0_3, %c0_4] : memref<16x384xbf16, #tpu.memory_space<vmem>>, vector<16x384xbf16>
    %cst = arith.constant dense<0.000000e+00> : vector<8x384xf32>
    %10 = tpu.matmul %8, %9, %cst {dimension_numbers = #tpu.dot_dimension_numbers<[1], [0], [0], [1], [0, 0, 1, 1], [], []>} : vector<8x16xbf16>, vector<16x384xbf16>, vector<8x384xf32> -> vector<8x384xf32>
    %cst_5 = arith.constant dense<0.000000e+00> : vector<384xf32>
    %11 = vector.multi_reduction <add>, %10, %cst_5 [0] : vector<8x384xf32> to vector<384xf32>
    %12 = vector.shape_cast %11 : vector<384xf32> to vector<1x384xf32>
    %13 = arith.mulf %10, %10 : vector<8x384xf32>
    %cst_6 = arith.constant dense<0.000000e+00> : vector<384xf32>
    %14 = vector.multi_reduction <add>, %13, %cst_6 [0] : vector<8x384xf32> to vector<384xf32>
    %15 = vector.shape_cast %14 : vector<384xf32> to vector<1x384xf32>
    %cst_7 = arith.constant 1.250000e-01 : f32
    %16 = vector.broadcast %cst_7 : f32 to vector<1x384xf32>
    %17 = arith.mulf %12, %16 : vector<1x384xf32>
    %cst_8 = arith.constant 1.250000e-01 : f32
    %18 = vector.broadcast %cst_8 : f32 to vector<1x384xf32>
    %19 = arith.mulf %15, %18 : vector<1x384xf32>
    %20 = arith.mulf %17, %17 : vector<1x384xf32>
    %21 = arith.subf %19, %20 : vector<1x384xf32>
    %cst_9 = arith.constant 0.000000e+00 : f32
    %22 = vector.broadcast %cst_9 : f32 to vector<1x384xf32>
    %23 = arith.maximumf %21, %22 : vector<1x384xf32>
    %cst_10 = arith.constant 9.99999974E-6 : f32
    %24 = vector.broadcast %cst_10 : f32 to vector<1x384xf32>
    %25 = arith.addf %23, %24 : vector<1x384xf32>
    %26 = math.rsqrt %25 : vector<1x384xf32>
    %27 = arith.mulf %1, %26 : vector<1x384xf32>
    %28 = arith.mulf %17, %27 : vector<1x384xf32>
    %29 = arith.subf %2, %28 : vector<1x384xf32>
    %30 = vector.broadcast %27 : vector<1x384xf32> to vector<8x384xf32>
    %31 = arith.mulf %10, %30 : vector<8x384xf32>
    %32 = vector.broadcast %29 : vector<1x384xf32> to vector<8x384xf32>
    %33 = arith.addf %31, %32 : vector<8x384xf32>
    %cst_11 = arith.constant 0.000000e+00 : f32
    %34 = vector.broadcast %cst_11 : f32 to vector<8x384xf32>
    %35 = arith.maximumf %33, %34 : vector<8x384xf32>
    %36 = arith.truncf %35 : vector<8x384xf32> to vector<8x384xbf16>
    %c0_12 = arith.constant 0 : index
    %c0_13 = arith.constant 0 : index
    %37 = vector.load %arg2[%c0_12, %c0_13] : memref<384x384xbf16, #tpu.memory_space<vmem>>, vector<384x384xbf16>
    %cst_14 = arith.constant dense<0.000000e+00> : vector<8x384xf32>
    %38 = tpu.matmul %36, %37, %cst_14 {dimension_numbers = #tpu.dot_dimension_numbers<[1], [0], [0], [1], [0, 0, 1, 1], [], []>} : vector<8x384xbf16>, vector<384x384xbf16>, vector<8x384xf32> -> vector<8x384xf32>
    %cst_15 = arith.constant dense<0.000000e+00> : vector<384xf32>
    %39 = vector.multi_reduction <add>, %38, %cst_15 [0] : vector<8x384xf32> to vector<384xf32>
    %40 = vector.shape_cast %39 : vector<384xf32> to vector<1x384xf32>
    %41 = arith.mulf %38, %38 : vector<8x384xf32>
    %cst_16 = arith.constant dense<0.000000e+00> : vector<384xf32>
    %42 = vector.multi_reduction <add>, %41, %cst_16 [0] : vector<8x384xf32> to vector<384xf32>
    %43 = vector.shape_cast %42 : vector<384xf32> to vector<1x384xf32>
    %cst_17 = arith.constant 1.250000e-01 : f32
    %44 = vector.broadcast %cst_17 : f32 to vector<1x384xf32>
    %45 = arith.mulf %40, %44 : vector<1x384xf32>
    %cst_18 = arith.constant 1.250000e-01 : f32
    %46 = vector.broadcast %cst_18 : f32 to vector<1x384xf32>
    %47 = arith.mulf %43, %46 : vector<1x384xf32>
    %48 = arith.mulf %45, %45 : vector<1x384xf32>
    %49 = arith.subf %47, %48 : vector<1x384xf32>
    %cst_19 = arith.constant 0.000000e+00 : f32
    %50 = vector.broadcast %cst_19 : f32 to vector<1x384xf32>
    %51 = arith.maximumf %49, %50 : vector<1x384xf32>
    %cst_20 = arith.constant 9.99999974E-6 : f32
    %52 = vector.broadcast %cst_20 : f32 to vector<1x384xf32>
    %53 = arith.addf %51, %52 : vector<1x384xf32>
    %54 = math.rsqrt %53 : vector<1x384xf32>
    %55 = arith.mulf %3, %54 : vector<1x384xf32>
    %56 = arith.mulf %45, %55 : vector<1x384xf32>
    %57 = arith.subf %4, %56 : vector<1x384xf32>
    %58 = vector.broadcast %55 : vector<1x384xf32> to vector<8x384xf32>
    %59 = arith.mulf %38, %58 : vector<8x384xf32>
    %60 = vector.broadcast %57 : vector<1x384xf32> to vector<8x384xf32>
    %61 = arith.addf %59, %60 : vector<8x384xf32>
    %cst_21 = arith.constant 0.000000e+00 : f32
    %62 = vector.broadcast %cst_21 : f32 to vector<8x384xf32>
    %63 = arith.maximumf %61, %62 : vector<8x384xf32>
    %64 = vector.broadcast %5 : vector<1x384xf32> to vector<8x384xf32>
    %65 = arith.mulf %63, %64 : vector<8x384xf32>
    %cst_22 = arith.constant dense<0.000000e+00> : vector<8xf32>
    %66 = vector.multi_reduction <add>, %65, %cst_22 [1] : vector<8x384xf32> to vector<8xf32>
    %67 = vector.shape_cast %66 : vector<8xf32> to vector<8x1xf32>
    %68 = vector.broadcast %6 : vector<1x1xf32> to vector<8x1xf32>
    %69 = arith.addf %67, %68 : vector<8x1xf32>
    %c0_23 = arith.constant 0 : index
    %c0_24 = arith.constant 0 : index
    %70 = vector.load %arg4[%c0_23, %c0_24] : memref<8x1xf32, #tpu.memory_space<vmem>>, vector<8x1xf32>
    tpu.vector_store %arg4[%c0_23, %c0_24], %69 {strides = array<i32>} : memref<8x1xf32, #tpu.memory_space<vmem>>, vector<8x1xf32>,
    return
  }
}

</mosaic_0001>

<bundles_post_ra>
// kernel: tpu_custom_call.1
= control target key start
LH: loop header
LB: loop body
LE: loop exit
PB: predicated region body
PF: predicated region fallthrough
CT: control target
= control target key end

     0   :  { %9 = vsyncpa [#allocation3], 0  ;;  %s1624_s0 = inlined_call_operand.hbm [shape: f32[8,16], index: 0, kind: input, shape index: {}]   ;;  %s1625_s1 = inlined_call_operand.hbm [shape: bf16[16,384], index: 1, kind: input, shape index: {}]   ;;  %s1626_s2 = inlined_call_operand.hbm [shape: bf16[384,384], index: 2, kind: input, shape index: {}]   ;;  %s1627_s3 = inlined_call_operand.hbm [shape: f32[8,384], index: 3, kind: input, shape index: {}]   ;;  %s1628_s4 = inlined_call_operand.vmem [shape: f32[8,1], index: 4, kind: output, shape index: {}]  }
   0x1   :  { %10 = vsyncpa [#allocation5], 0 }
   0x2   :  { %11 = vsyncpa [#allocation8], 0  ;;  %s1434_s15 = smov [#allocation4]   ;;  %s1340_s19 = scalar_lea.hbm %s1625_s1, 384 }
   0x3   :  { %s27_s16 = sshll.u32 %s1434_s15, 4  ;;  %p1341_p0 = scmp.ne.s32.totalorder %s1625_s1, %s1340_s19  ;;  %s28_s16 = int_to_ptr.vmem [resolvable:$true] %s27_s16 }
   0x4   :  { %p1344_p1 = scmp.lt.u32.totalorder %s1340_s19, %s1625_s1 }
   0x6   :  { %p1346_p2 = pnand %p1344_p1, %p1341_p0 }
   0x8   :  { %1349 = shalt.err (!%p1346_p2)
}
   0x9   :  { %s1350_s24 = scalar_lea.vmem %s28_s16, 384  ;;  %p1355_p4 = scmp.lt.s32.totalorder %s28_s16, %s28_s16 }
   0xa   :  { %p1351_p3 = scmp.ne.s32.totalorder %s28_s16, %s1350_s24  ;;  %p1356_p5 = scmp.lt.s32.totalorder %s1350_s24, %s1350_s24 }
   0xc   :  { %p1357_p6 = por %p1356_p5, %p1355_p4 }
   0xe   :  { %p1358_p7 = pnand %p1357_p6, %p1351_p3 }
  0x10   :  { %1361 = shalt.err (!%p1358_p7)
}
  0x11   :  { %s1435_s25 = smov 192   ;;  %s1436_s26 = smov 12  }
  0x12   :  { %33 = dma.hbm_to_vmem [thread:$0]  %s1625_s1, 384, %s28_s16, [#allocation5], %s1435_s25, %s1435_s25, %s1436_s26  }
  0x13   :  { %s1437_s29 = smov [#allocation2]   ;;  %s1438_s5 = smov [#allocation6]  }
  0x14   :  { %s18_s30 = sshll.u32 %s1437_s29, 4  ;;  %s39_s6 = sshll.u32 %s1438_s5, 4  ;;  %s19_s30 = int_to_ptr.vmem [resolvable:$true] %s18_s30  ;;  %s40_s6 = int_to_ptr.vmem [resolvable:$true] %s39_s6 }
  0x15   :  { %s1362_s9 = scalar_lea.hbm %s1624_s0, 128 }
  0x16   :  { %p1363_p8 = scmp.ne.s32.totalorder %s1624_s0, %s1362_s9  ;;  %p1366_p9 = scmp.lt.u32.totalorder %s1362_s9, %s1624_s0 }
  0x18   :  { %p1368_p10 = pnand %p1366_p9, %p1363_p8 }
  0x1a   :  { %1371 = shalt.err (!%p1368_p10)
}
  0x1b   :  { %s1372_s1 = scalar_lea.vmem %s19_s30, 128  ;;  %p1377_p12 = scmp.lt.s32.totalorder %s19_s30, %s19_s30 }
  0x1c   :  { %p1373_p11 = scmp.ne.s32.totalorder %s19_s30, %s1372_s1  ;;  %p1378_p13 = scmp.lt.s32.totalorder %s1372_s1, %s1372_s1 }
  0x1e   :  { %p1379_p0 = por %p1378_p13, %p1377_p12 }
  0x20   :  { %p1380_p1 = pnand %p1379_p0, %p1373_p11 }
  0x22   :  { %1383 = shalt.err (!%p1380_p1)
}
  0x23   :  { %21 = dma.hbm_to_vmem [thread:$0]  %s1624_s0, 128, %s19_s30, [#allocation3]  }
  0x24   :  { %s1384_s18 = scalar_lea.hbm %s1626_s2, 9216 }
  0x25   :  { %p1385_p2 = scmp.ne.s32.totalorder %s1626_s2, %s1384_s18  ;;  %p1388_p3 = scmp.lt.u32.totalorder %s1384_s18, %s1626_s2 }
  0x27   :  { %p1390_p4 = pnand %p1388_p3, %p1385_p2 }
  0x29   :  { %1393 = shalt.err (!%p1390_p4)
}
  0x2a   :  { %s1394_s23 = scalar_lea.vmem %s40_s6, 9216  ;;  %p1399_p6 = scmp.lt.s32.totalorder %s40_s6, %s40_s6 }
  0x2b   :  { %p1395_p5 = scmp.ne.s32.totalorder %s40_s6, %s1394_s23  ;;  %p1400_p7 = scmp.lt.s32.totalorder %s1394_s23, %s1394_s23 }
  0x2d   :  { %p1401_p8 = por %p1400_p7, %p1399_p6 }
  0x2f   :  { %p1402_p9 = pnand %p1401_p8, %p1395_p5 }
  0x31   :  { %1405 = shalt.err (!%p1402_p9)
}
  0x32   :  { %45 = dma.hbm_to_vmem [thread:$0]  %s1626_s2, 9216, %s40_s6, [#allocation5], %s1435_s25, %s1435_s25, %s1436_s26  }
  0x33   :  { %s1439_s27 = smov [#allocation7]   ;;  %s1406_s5 = scalar_lea.hbm %s1627_s3, 384 }
  0x34   :  { %s52_s28 = sshll.u32 %s1439_s27, 4  ;;  %p1407_p10 = scmp.ne.s32.totalorder %s1627_s3, %s1406_s5  ;;  %s53_s28 = int_to_ptr.vmem [resolvable:$true] %s52_s28 }
  0x35   :  { %p1410_p11 = scmp.lt.u32.totalorder %s1406_s5, %s1627_s3 }
  0x37   :  { %p1412_p12 = pnand %p1410_p11, %p1407_p10 }
  0x39   :  { %1415 = shalt.err (!%p1412_p12)
}
  0x3a   :  { %s1416_s11 = scalar_lea.vmem %s53_s28, 384  ;;  %p1421_p0 = scmp.lt.s32.totalorder %s53_s28, %s53_s28 }
  0x3b   :  { %p1417_p13 = scmp.ne.s32.totalorder %s53_s28, %s1416_s11  ;;  %p1422_p1 = scmp.lt.s32.totalorder %s1416_s11, %s1416_s11 }
  0x3d   :  { %p1423_p2 = por %p1422_p1, %p1421_p0 }
  0x3f   :  { %p1424_p3 = pnand %p1423_p2, %p1417_p13 }
  0x41   :  { %1427 = shalt.err (!%p1424_p3)
}
  0x42   :  { %55 = dma.hbm_to_vmem [thread:$0]  %s1627_s3, 384, %s53_s28, [#allocation8]  }
  0x43   :  { %1428 = dma.done.wait [#allocation3], 128  }
  0x44   :  { %1429 = vsyncadd [#allocation3], 4294967168 }
  0x45   :  { %1430 = dma.done.wait [#allocation5], 9600  }
  0x46   :  { %1431 = vsyncadd [#allocation5], 4294957696 }
  0x47   :  { %1432 = dma.done.wait [#allocation8], 384  }
  0x48   :  { %1433 = vsyncadd [#allocation8], 4294966912  ;;  %v1440_v0 = vmov 0   ;;  %v1228_v1 = vld [vmem:[#allocation4 + $0x4] ss:$12 sps:$4 sm:$0xff]   ;;  %v72_v3 = vld [vmem:[#allocation2] sm:$0xff] }
  0x49   :  { %130 = vmatprep.mubr.bf16.mxu1 %v1440_v0  ;;  %v1230_v2 = vld [vmem:[#allocation4] ss:$12 sps:$4 sm:$0xff]   ;;  %98 = vmatprep.subr.bf16.mxu1 %v1228_v1  ;;  %v73_v4 = vpack.c.bf16 %v72_v3, %v72_v3  ;;  %v1231_v5 = vld [vmem:[#allocation4 + $0x8] ss:$12 sps:$4 sm:$0xff]   ;;  %vm94_vm0 = vcmask 130048   ;;  %v1441_v8 = vmov 0.0  }
  0x4a   :  { %99 = vmatpush1.bf16.msra.mxu1 %v1230_v2  ;;  %v1232_v6 = vld [vmem:[#allocation6 + $0x4] ss:$12 sps:$4 sm:$0xff]   ;;  %v1234_v7 = vld [vmem:[#allocation6] ss:$12 sps:$4 sm:$0xff]   ;;  %v1235_v9 = vld [vmem:[#allocation6 + $0x1c] ss:$12 sps:$4 sm:$0xff]  }
  0x4b   :  { %1189 = vmatprep.subr.bf16.mxu1 %v1441_v8  ;;  %773 = vmatprep.subr.bf16.mxu0 %v1232_v6  ;;  %v1237_v10 = vld [vmem:[#allocation6 + $0x18] ss:$12 sps:$4 sm:$0xff]   ;;  %vm1442_vm1 = vmmov 0   ;;  %v1238_v11 = vld [vmem:[#allocation6 + $0x34] ss:$12 sps:$4 sm:$0xff]   ;;  %vm1070_vm2 = vcmask 7168  }
  0x4c   :  { %774 = vmatpush1.bf16.msra.mxu0 %v1234_v7  ;;  %v1240_v12 = vld [vmem:[#allocation6 + $0x30] ss:$12 sps:$4 sm:$0xff]   ;;  %v1241_v13 = vld [vmem:[#allocation6 + $0x4c] ss:$12 sps:$4 sm:$0xff]   ;;  %v1243_v14 = vld [vmem:[#allocation6 + $0x48] ss:$12 sps:$4 sm:$0xff]  }
  0x4d   :  { %1082 = vmatmul.mubr.msk.bf16.vlgmr.msra.gmra.mrb[0].mxu1 %vm94_vm0, %v73_v4  ;;  %775 = vmatprep.subr.bf16.mxu0 %v1235_v9  ;;  %v1244_v15 = vld [vmem:[#allocation6 + $0x64] ss:$12 sps:$4 sm:$0xff]   ;;  %v1246_v16 = vld [vmem:[#allocation6 + $0x60] ss:$12 sps:$4 sm:$0xff]   ;;  %v1247_v17 = vld [vmem:[#allocation6 + $0x7c] ss:$12 sps:$4 sm:$0xff]  }
  0x4e   :  { %1190 = vmatpush3.bf16.msra.mxu1 %v1231_v5  ;;  %1191 = vmatprep.mubr.msk.bf16.mxu1 %vm1442_vm1, %v1441_v8  ;;  %v1249_v18 = vld [vmem:[#allocation6 + $0x78] ss:$12 sps:$4 sm:$0xff]   ;;  %v1250_v19 = vld [vmem:[#allocation6 + $0x94] ss:$12 sps:$4 sm:$0xff]   ;;  %v1252_v20 = vld [vmem:[#allocation6 + $0x90] ss:$12 sps:$4 sm:$0xff]  }
  0x4f   :  { %v1253_v21 = vld [vmem:[#allocation6 + $0xac] ss:$12 sps:$4 sm:$0xff]   ;;  %v1255_v22 = vld [vmem:[#allocation6 + $0xa8] ss:$12 sps:$4 sm:$0xff]   ;;  %v1256_v23 = vld [vmem:[#allocation6 + $0xc4] ss:$12 sps:$4 sm:$0xff]  }
  0x50   :  { %776 = vmatpush1.bf16.msra.mxu0 %v1237_v10  ;;  %v1258_v24 = vld [vmem:[#allocation6 + $0xc8] ss:$12 sps:$4 sm:$0xff]   ;;  %v1259_v25 = vld [vmem:[#allocation6 + $0xc0] ss:$12 sps:$4 sm:$0xff]   ;;  %v1264_v29 = vld [vmem:[#allocation6 + $0xd8] ss:$12 sps:$4 sm:$0xff]  }
  0x51   :  { %777 = vmatprep.subr.bf16.mxu0 %v1238_v11  ;;  %v1260_v26 = vld [vmem:[#allocation6 + $0x8] ss:$12 sps:$4 sm:$0xff]   ;;  %1158 = vmatprep.subr.bf16.mxu1 %v1258_v24  ;;  %v1263_v28 = vld [vmem:[#allocation6 + $0xe0] ss:$12 sps:$4 sm:$0xff]   ;;  %v1268_v32 = vld [vmem:[#allocation6 + $0xf8] ss:$12 sps:$4 sm:$0xff]  }
  0x52   :  { %v1261_v27 = vld [vmem:[#allocation6 + $0xdc] ss:$12 sps:$4 sm:$0xff]   ;;  %v1265_v30 = vld [vmem:[#allocation6 + $0x20] ss:$12 sps:$4 sm:$0xff]   ;;  %v1270_v34 = vld [vmem:[#allocation6 + $0x38] ss:$12 sps:$4 sm:$0xff]  }
  0x53   :  { %v1266_v31 = vld [vmem:[#allocation6 + $0xf4] ss:$12 sps:$4 sm:$0xff]   ;;  %v1269_v33 = vld [vmem:[#allocation6 + $0xf0] ss:$12 sps:$4 sm:$0xff]   ;;  %v1271_v35 = vld [vmem:[#allocation6 + $0x10c] ss:$12 sps:$4 sm:$0xff]  }
  0x54   :  { %778 = vmatpush1.bf16.msra.mxu0 %v1240_v12  ;;  %v1273_v36 = vld [vmem:[#allocation6 + $0x110] ss:$12 sps:$4 sm:$0xff]   ;;  %v1274_v37 = vld [vmem:[#allocation6 + $0x108] ss:$12 sps:$4 sm:$0xff]   ;;  %v1279_v41 = vld [vmem:[#allocation6 + $0x120] ss:$12 sps:$4 sm:$0xff]  }
  0x55   :  { %1192 = vmatmul.mubr.msk.bf16.vlgmr.msra.gmra.mrb[4].mxu1 %vm94_vm0, %v73_v4  ;;  %779 = vmatprep.subr.bf16.mxu0 %v1241_v13  ;;  %v1275_v38 = vld [vmem:[#allocation6 + $0x50] ss:$12 sps:$4 sm:$0xff]   ;;  %v1278_v40 = vld [vmem:[#allocation6 + $0x128] ss:$12 sps:$4 sm:$0xff]   ;;  %v1283_v44 = vld [vmem:[#allocation6 + $0x140] ss:$12 sps:$4 sm:$0xff]  }
  0x56   :  { %1159 = vmatpush3.bf16.msra.mxu1 %v1260_v26  ;;  %v1276_v39 = vld [vmem:[#allocation6 + $0x124] ss:$12 sps:$4 sm:$0xff]   ;;  %v1280_v42 = vld [vmem:[#allocation6 + $0x68] ss:$12 sps:$4 sm:$0xff]   ;;  %v1285_v46 = vld [vmem:[#allocation6 + $0x80] ss:$12 sps:$4 sm:$0xff]  }
  0x57   :  { %1160 = vmatprep.subr.bf16.mxu1 %v1263_v28  ;;  %v1281_v43 = vld [vmem:[#allocation6 + $0x13c] ss:$12 sps:$4 sm:$0xff]   ;;  %v1284_v45 = vld [vmem:[#allocation6 + $0x138] ss:$12 sps:$4 sm:$0xff]   ;;  %v1286_v47 = vld [vmem:[#allocation6 + $0x154] ss:$12 sps:$4 sm:$0xff]  }
  0x58   :  { %780 = vmatpush1.bf16.msra.mxu0 %v1243_v14  ;;  %v1288_v48 = vld [vmem:[#allocation6 + $0x158] ss:$12 sps:$4 sm:$0xff]   ;;  %v1289_v49 = vld [vmem:[#allocation6 + $0x150] ss:$12 sps:$4 sm:$0xff]   ;;  %v1294_v53 = vld [vmem:[#allocation6 + $0x168] ss:$12 sps:$4 sm:$0xff]  }
  0x59   :  { %781 = vmatprep.subr.bf16.mxu0 %v1244_v15  ;;  %v1290_v50 = vld [vmem:[#allocation6 + $0x98] ss:$12 sps:$4 sm:$0xff]   ;;  %v1293_v52 = vld [vmem:[#allocation6 + $0x170] ss:$12 sps:$4 sm:$0xff]  }
  0x5a   :  { %1161 = vmatpush3.bf16.msra.mxu1 %v1265_v30  ;;  %v1291_v51 = vld [vmem:[#allocation6 + $0x16c] ss:$12 sps:$4 sm:$0xff]   ;;  %v1295_v54 = vld [vmem:[#allocation6 + $0xb0] ss:$12 sps:$4 sm:$0xff]  }
  0x5b   :  { %1162 = vmatprep.subr.bf16.mxu1 %v1268_v32  ;;  %v1298_v55 = vld [vmem:[#allocation6 + $0x184] ss:$12 sps:$4 sm:$0xff]  }
  0x5c   :  { %782 = vmatpush1.bf16.msra.mxu0 %v1246_v16 }
  0x5d   :  { %783 = vmatprep.subr.bf16.mxu0 %v1247_v17 }
  0x5e   :  { %1163 = vmatpush3.bf16.msra.mxu1 %v1270_v34 }
  0x5f   :  { %1164 = vmatprep.subr.bf16.mxu1 %v1273_v36 }
  0x60   :  { %784 = vmatpush1.bf16.msra.mxu0 %v1249_v18 }
  0x61   :  { %785 = vmatprep.subr.bf16.mxu0 %v1250_v19 }
  0x62   :  { %1165 = vmatpush3.bf16.msra.mxu1 %v1275_v38 }
  0x63   :  { %1166 = vmatprep.subr.bf16.mxu1 %v1278_v40 }
  0x64   :  { %786 = vmatpush1.bf16.msra.mxu0 %v1252_v20 }
  0x65   :  { %787 = vmatprep.subr.bf16.mxu0 %v1253_v21 }
  0x66   :  { %1167 = vmatpush3.bf16.msra.mxu1 %v1280_v42 }
  0x67   :  { %1168 = vmatprep.subr.bf16.mxu1 %v1283_v44 }
  0x68   :  { %788 = vmatpush1.bf16.msra.mxu0 %v1255_v22 }
  0x69   :  { %789 = vmatprep.subr.bf16.mxu0 %v1256_v23 }
  0x6a   :  { %1169 = vmatpush3.bf16.msra.mxu1 %v1285_v46 }
  0x6b   :  { %1170 = vmatprep.subr.bf16.mxu1 %v1288_v48 }
  0x6c   :  { %790 = vmatpush1.bf16.msra.mxu0 %v1259_v25 }
  0x6d   :  { %791 = vmatprep.subr.bf16.mxu0 %v1261_v27 }
  0x6e   :  { %1171 = vmatpush3.bf16.msra.mxu1 %v1290_v50 }
  0x6f   :  { %1172 = vmatprep.subr.bf16.mxu1 %v1293_v52 }
  0x70   :  { %792 = vmatpush1.bf16.msra.mxu0 %v1264_v29 }
  0x71   :  { %793 = vmatprep.subr.bf16.mxu0 %v1266_v31 }
  0x72   :  { %1173 = vmatpush3.bf16.msra.mxu1 %v1295_v54 }
  0x73   :  { %1195 = vmatprep.subr.bf16.mxu1 %v1441_v8 }
  0x74   :  { %794 = vmatpush1.bf16.msra.mxu0 %v1269_v33 }
  0x75   :  { %795 = vmatprep.subr.bf16.mxu0 %v1271_v35 }
  0x78   :  { %796 = vmatpush1.bf16.msra.mxu0 %v1274_v37 }
  0x79   :  { %797 = vmatprep.subr.bf16.mxu0 %v1276_v39 }
  0x7c   :  { %798 = vmatpush1.bf16.msra.mxu0 %v1279_v41 }
  0x7d   :  { %799 = vmatprep.subr.bf16.mxu0 %v1281_v43 }
  0x80   :  { %800 = vmatpush1.bf16.msra.mxu0 %v1284_v45 }
  0x81   :  { %801 = vmatprep.subr.bf16.mxu0 %v1286_v47 }
  0x84   :  { %802 = vmatpush1.bf16.msra.mxu0 %v1289_v49 }
  0x85   :  { %803 = vmatprep.subr.bf16.mxu0 %v1291_v51 }
  0x88   :  { %804 = vmatpush1.bf16.msra.mxu0 %v1294_v53 }
  0x89   :  { %814 = vmatprep.subr.bf16.mxu0 %v1298_v55 }
 0x120   :  { %v1529_v56 = vpop.f32.mrb[0].mxu1 }
 0x121   :  { %v179_v57 = vrot.slane %v1529_v56, 4  ;;  %v197_v58 = vmul.f32 %v1529_v56, %v1529_v56  ;;  %v1534_v59 = vpop.f32.mrb[1].mxu1 }
 0x122   :  { %v185_v60 = vrot.slane %v1534_v59, 4  ;;  %v198_v61 = vmul.f32 %v1534_v59, %v1534_v59  ;;  %v136_v62 = vpop.f32.mrb[2].mxu1 }
 0x123   :  { %v180_v63 = vadd.f32 %v179_v57, %v1529_v56  ;;  %v200_v1 = vrot.slane %v197_v58, 4  ;;  %v137_v2 = vpop.f32.mrb[3].mxu1  ;;  %v257_v57 = vlaneseq  ;;  %v1551_v62 = vld [vmem:[#allocation7 + $0x8] sm:$0xff] }
 0x124   :  { %v186_v3 = vadd.f32 %v185_v60, %v1534_v59  ;;  %v206_v4 = vrot.slane %v198_v61, 4 }
 0x125   :  { %v181_v5 = vrot.slane %v180_v63, 2  ;;  %v201_v6 = vadd.f32 %v200_v1, %v197_v58  ;;  %v1547_v60 = vshrl.u32 %v257_v57, 7  ;;  %v1324_v57 = vld [vmem:[#allocation6 + $0x228] ss:$12 sps:$4 sm:$0xff]  }
 0x126   :  { %v187_v7 = vrot.slane %v186_v3, 2  ;;  %v207_v9 = vadd.f32 %v206_v4, %v198_v61  ;;  %v1549_v61 = vld [vmem:[#allocation7] sm:$0xff] }
 0x127   :  { %v182_v10 = vadd.f32 %v181_v5, %v180_v63  ;;  %v202_v11 = vrot.slane %v201_v6, 2  ;;  %v1555_v4 = vsub.s32 0, %v1547_v60 }
 0x128   :  { %v188_v12 = vadd.f32 %v187_v7, %v186_v3  ;;  %v208_v13 = vrot.slane %v207_v9, 2  ;;  %v1541_v14 = vpop.f32.mrb[4].mxu1 }
 0x129   :  { %v183_v15 = vrot.slane %v182_v10, 1  ;;  %v203_v16 = vadd.f32 %v202_v11, %v201_v6  ;;  %v191_v17 = vrot.slane %v1541_v14, 4  ;;  %v199_v18 = vmul.f32 %v1541_v14, %v1541_v14  ;;  %v1193_v19 = vpop.f32.mrb[5].mxu1 }
 0x12a   :  { %v189_v20 = vrot.slane %v188_v12, 1  ;;  %v209_v21 = vadd.f32 %v208_v13, %v207_v9  ;;  %v176_v22 = vpop.f32.mrb[6].mxu1  ;;  %v1560_v11 = vsub.s32 1, %v1547_v60 }
 0x12b   :  { %v184_v23 = vadd.f32 %v183_v15, %v182_v10  ;;  %v204_v24 = vrot.slane %v203_v16, 1  ;;  %v192_v25 = vadd.f32 %v191_v17, %v1541_v14  ;;  %v212_v26 = vrot.slane %v199_v18, 4  ;;  %v1194_v27 = vpop.f32.mrb[7].mxu1 }
 0x12c   :  { %v190_v28 = vadd.f32 %v189_v20, %v188_v12  ;;  %v210_v29 = vrot.slane %v209_v21, 1  ;;  %v1296_v27 = vld [vmem:[#allocation6 + $0x180] ss:$12 sps:$4 sm:$0xff]  }
 0x12d   :  { %v205_v30 = vadd.f32 %v204_v24, %v203_v16  ;;  %v218_v31 = vmul.f32 0.125, %v184_v23  ;;  %v193_v32 = vrot.slane %v192_v25, 2  ;;  %v213_v33 = vadd.f32 %v212_v26, %v199_v18 }
 0x12e   :  { %v211_v34 = vadd.f32 %v210_v29, %v209_v21  ;;  %v219_v35 = vmul.f32 0.125, %v190_v28  ;;  %v1299_v28 = vld [vmem:[#allocation6 + $0x188] ss:$12 sps:$4 sm:$0xff]  }
 0x12f   :  { %v221_v36 = vmul.f32 0.125, %v205_v30  ;;  %v224_v37 = vmul.f32 %v218_v31, %v218_v31  ;;  %v194_v38 = vadd.f32 %v193_v32, %v192_v25  ;;  %v214_v39 = vrot.slane %v213_v33, 2  ;;  %v1302_v30 = vld [vmem:[#allocation6 + $0x19c] ss:$12 sps:$4 sm:$0xff]   ;;  %v1569_v32 = vld [vmem:[#allocation7 + $0x10] sm:$0xff] }
 0x130   :  { %v222_v40 = vmul.f32 0.125, %v211_v34  ;;  %v225_v41 = vmul.f32 %v219_v35, %v219_v35  ;;  %v1306_v34 = vld [vmem:[#allocation6 + $0x1b4] ss:$12 sps:$4 sm:$0xff]  }
 0x131   :  { %v227_v42 = vsub.f32 %v221_v36, %v224_v37  ;;  %v195_v43 = vrot.slane %v194_v38, 1  ;;  %v215_v44 = vadd.f32 %v214_v39, %v213_v33  ;;  %v1307_v36 = vld [vmem:[#allocation6 + $0x1b8] ss:$12 sps:$4 sm:$0xff]   ;;  %v1308_v39 = vld [vmem:[#allocation6 + $0x1c8] ss:$12 sps:$4 sm:$0xff]  }
 0x132   :  { %v228_v45 = vsub.f32 %v222_v40, %v225_v41  ;;  %v1311_v40 = vld [vmem:[#allocation6 + $0x1d0] ss:$12 sps:$4 sm:$0xff]  }
 0x133   :  { %v230_v46 = vmax.f32 %v227_v42, 0.0  ;;  %v196_v47 = vadd.f32 %v195_v43, %v194_v38  ;;  %v216_v48 = vrot.slane %v215_v44, 1  ;;  %v1310_v38 = vld [vmem:[#allocation6 + $0x1cc] ss:$12 sps:$4 sm:$0xff]   ;;  %v1315_v43 = vld [vmem:[#allocation6 + $0x1e8] ss:$12 sps:$4 sm:$0xff]  }
 0x134   :  { %v231_v49 = vmax.f32 %v228_v45, 0.0  ;;  %v1312_v42 = vld [vmem:[#allocation6 + $0x1e0] ss:$12 sps:$4 sm:$0xff]   ;;  %v1318_v45 = vld [vmem:[#allocation6 + $0x1fc] ss:$12 sps:$4 sm:$0xff]  }
 0x135   :  { %v233_v50 = vadd.f32 1e-05, %v230_v46  ;;  %v217_v51 = vadd.f32 %v216_v48, %v215_v44  ;;  %v220_v52 = vmul.f32 0.125, %v196_v47  ;;  %v1316_v47 = vld [vmem:[#allocation6 + $0x1f8] ss:$12 sps:$4 sm:$0xff]  }
 0x136   :  { %v234_v53 = vadd.f32 1e-05, %v231_v49  ;;  %v1319_v48 = vld [vmem:[#allocation6 + $0x200] ss:$12 sps:$4 sm:$0xff]  }
 0x137   :  { %1328 = vrsqrt.f32 %v233_v50  ;;  %v223_v54 = vmul.f32 0.125, %v217_v51  ;;  %v226_v55 = vmul.f32 %v220_v52, %v220_v52  ;;  %v1322_v50 = vld [vmem:[#allocation6 + $0x214] ss:$12 sps:$4 sm:$0xff]  }
 0x138   :  { %1330 = vrsqrt.f32 %v234_v53  ;;  %v1323_v53 = vld [vmem:[#allocation6 + $0x218] ss:$12 sps:$4 sm:$0xff]  }
 0x139   :  { %v229_v58 = vsub.f32 %v223_v54, %v226_v55  ;;  %v1326_v55 = vld [vmem:[#allocation6 + $0x22c] ss:$12 sps:$4 sm:$0xff]  }
 0x13b   :  { %v232_v1 = vmax.f32 %v229_v58, 0.0  ;;  %v1327_v58 = vld [vmem:[#allocation6 + $0x230] ss:$12 sps:$4 sm:$0xff]  }
 0x13d   :  { %v235_v7 = vadd.f32 1e-05, %v232_v1 }
 0x13f   :  { %1332 = vrsqrt.f32 %v235_v7 }
 0x141   :  { %v1329_v63 = vpop.eup %1328 }
 0x142   :  { %v1331_v2 = vpop.eup %1330  ;;  %v239_v3 = vmul.f32 %v1329_v63, %v1549_v61 }
 0x143   :  { %v240_v5 = vmul.f32 %v1331_v2, %v1551_v62 }
 0x144   :  { %v242_v6 = vmul.f32 %v239_v3, %v218_v31  ;;  %v260_v10 = vrot.slane %v239_v3, %v1555_v4 }
 0x145   :  { %v243_v9 = vmul.f32 %v240_v5, %v219_v35  ;;  %v264_v15 = vrot.slane %v240_v5, %v1555_v4  ;;  %v1304_v35 = vld [vmem:[#allocation6 + $0x1b0] ss:$12 sps:$4 sm:$0xff]  }
 0x146   :  { %v248_v12 = vrot.slane %v242_v6, 7  ;;  %v269_v18 = vmul.f32 %v260_v10, %v1529_v56  ;;  %v1300_v56 = vld [vmem:[#allocation6 + $0x198] ss:$12 sps:$4 sm:$0xff]  }
 0x147   :  { %v249_v13 = vrot.slane %v243_v9, 7  ;;  %v270_v20 = vmul.f32 %v264_v15, %v1534_v59  ;;  %v1303_v59 = vld [vmem:[#allocation6 + $0x1a0] ss:$12 sps:$4 sm:$0xff]  }
 0x148   :  { %v254_v16 = vsub.f32 %v1549_v61, %v248_v12 }
 0x149   :  { %v255_v17 = vsub.f32 %v1551_v62, %v249_v13  ;;  %v1333_v31 = vpop.eup %1332 }
 0x14a   :  { %v275_v19 = vrot.slane %v254_v16, %v1560_v11  ;;  %v241_v33 = vmul.f32 %v1333_v31, %v1569_v32 }
 0x14b   :  { %v279_v21 = vrot.slane %v255_v17, %v1560_v11 }
 0x14c   :  { %v284_v22 = vadd.f32 %v275_v19, %v269_v18  ;;  %v244_v37 = vmul.f32 %v241_v33, %v220_v52  ;;  %v268_v46 = vrot.slane %v241_v33, %v1555_v4  ;;  %v1320_v52 = vld [vmem:[#allocation6 + $0x210] ss:$12 sps:$4 sm:$0xff]  }
 0x14d   :  { %v285_v23 = vadd.f32 %v279_v21, %v270_v20 }
 0x14e   :  { %v287_v24 = vmax.f32 %v284_v22, 0.0  ;;  %v250_v41 = vrot.slane %v244_v37, 7  ;;  %v271_v51 = vmul.f32 %v268_v46, %v1541_v14 }
 0x14f   :  { %v288_v25 = vmax.f32 %v285_v23, 0.0 }
 0x150   :  { %v290_v29 = vpack.c.bf16 %v287_v24, %v287_v24  ;;  %v256_v44 = vsub.f32 %v1569_v32, %v250_v41 }
 0x151   :  { %v291_v26 = vpack.c.bf16 %v288_v25, %v288_v25 }
 0x152   :  { %v283_v49 = vrot.slane %v256_v44, %v1560_v11 }
 0x153   :  { %805 = vmatprep.mubr.bf16.mxu0 %v291_v26  ;;  %887 = vmatprep.mubr.bf16.mxu1 %v291_v26 }
 0x154   :  { %806 = vmatmul.mubr.bf16.vlgmr.msra.gmra.mrb[0].mxu0 %v290_v29  ;;  %888 = vmatmul.mubr.bf16.vlgmr.msra.gmra.mrb[8].mxu1 %v290_v29  ;;  %v286_v54 = vadd.f32 %v283_v49, %v271_v51 }
 0x155   :  { %815 = vmatpush1.bf16.msra.mxu0 %v1296_v27  ;;  %1196 = vmatpush3.bf16.msra.mxu1 %v1299_v28 }
 0x156   :  { %816 = vmatprep.subr.bf16.mxu0 %v1302_v30  ;;  %1197 = vmatprep.subr.bf16.mxu1 %v1441_v8  ;;  %v289_v63 = vmax.f32 %v286_v54, 0.0 }
 0x157   :  { %846 = vmatprep.mubr.bf16.mxu0 %v1440_v0  ;;  %1211 = vmatprep.mubr.msk.bf16.mxu1 %vm1442_vm1, %v1441_v8  ;;  %v1314_v0 = vld [vmem:[#allocation6 + $0x1e4] ss:$12 sps:$4 sm:$0xff]  }
 0x158   :  { %v292_v14 = vpack.c.bf16 %v289_v63, %v289_v63 }
 0x159   :  { %817 = vmatpush1.bf16.msra.mxu0 %v1300_v56  ;;  %1198 = vmatpush3.bf16.msra.mxu1 %v1303_v59 }
 0x15a   :  { %818 = vmatprep.subr.bf16.mxu0 %v1306_v34  ;;  %1199 = vmatprep.subr.bf16.mxu1 %v1441_v8 }
 0x15d   :  { %819 = vmatpush1.bf16.msra.mxu0 %v1304_v35  ;;  %1200 = vmatpush3.bf16.msra.mxu1 %v1307_v36 }
 0x15e   :  { %820 = vmatprep.subr.bf16.mxu0 %v1310_v38  ;;  %1201 = vmatprep.subr.bf16.mxu1 %v1441_v8 }
 0x161   :  { %821 = vmatpush1.bf16.msra.mxu0 %v1308_v39  ;;  %1202 = vmatpush3.bf16.msra.mxu1 %v1311_v40 }
 0x162   :  { %822 = vmatprep.subr.bf16.mxu0 %v1314_v0  ;;  %1203 = vmatprep.subr.bf16.mxu1 %v1441_v8 }
 0x165   :  { %823 = vmatpush1.bf16.msra.mxu0 %v1312_v42  ;;  %1204 = vmatpush3.bf16.msra.mxu1 %v1315_v43 }
 0x166   :  { %824 = vmatprep.subr.bf16.mxu0 %v1318_v45  ;;  %1205 = vmatprep.subr.bf16.mxu1 %v1441_v8 }
 0x169   :  { %825 = vmatpush1.bf16.msra.mxu0 %v1316_v47  ;;  %1206 = vmatpush3.bf16.msra.mxu1 %v1319_v48 }
 0x16a   :  { %826 = vmatprep.subr.bf16.mxu0 %v1322_v50  ;;  %1207 = vmatprep.subr.bf16.mxu1 %v1441_v8 }
 0x16d   :  { %827 = vmatpush1.bf16.msra.mxu0 %v1320_v52  ;;  %1208 = vmatpush3.bf16.msra.mxu1 %v1323_v53 }
 0x16e   :  { %828 = vmatprep.subr.bf16.mxu0 %v1326_v55  ;;  %1209 = vmatprep.subr.bf16.mxu1 %v1441_v8 }
 0x171   :  { %829 = vmatpush1.bf16.msra.mxu0 %v1324_v57  ;;  %1210 = vmatpush3.bf16.msra.mxu1 %v1327_v58 }
 0x174   :  { %847 = vmatmul.mubr.bf16.vlgmr.msra.gmra.mrb[0].mxu0 %v292_v14  ;;  %1212 = vmatmul.mubr.bf16.vlgmr.msra.gmra.mrb[12].mxu1 %v292_v14 }
 0x227   :  { %v1174_v1 = vpop.f32.mrb[8].mxu1 }
 0x228   :  { %v1175_v2 = vpop.f32.mrb[9].mxu1 }
 0x229   :  { %v1176_v3 = vadd.f32 %v1175_v2, %v1174_v1  ;;  %v1177_v4 = vpop.f32.mrb[10].mxu1 }
 0x22a   :  { %v1178_v5 = vpop.f32.mrb[11].mxu1 }
 0x247   :  { %v1586_v6 = vpop.f32.mrb[0].mxu0  ;;  %v929_v7 = vpop.f32.mrb[12].mxu1 }
 0x248   :  { %v935_v9 = vrot.slane %v1586_v6, 4  ;;  %v953_v10 = vmul.f32 %v1586_v6, %v1586_v6  ;;  %v1591_v8 = vadd.f32 %v1176_v3, %v929_v7  ;;  %v1593_v11 = vpop.f32.mrb[1].mxu0  ;;  %v1213_v12 = vpop.f32.mrb[13].mxu1 }
 0x249   :  { %v941_v13 = vrot.slane %v1593_v11, 4  ;;  %v954_v15 = vmul.f32 %v1593_v11, %v1593_v11  ;;  %v852_v16 = vpop.f32.mrb[2].mxu0  ;;  %v932_v17 = vpop.f32.mrb[14].mxu1 }
 0x24a   :  { %v936_v18 = vadd.f32 %v935_v9, %v1586_v6  ;;  %v956_v19 = vrot.slane %v953_v10, 4  ;;  %v947_v20 = vrot.slane %v1591_v8, 4  ;;  %v955_v21 = vmul.f32 %v1591_v8, %v1591_v8  ;;  %v853_v22 = vpop.f32.mrb[3].mxu0  ;;  %v1214_v23 = vpop.f32.mrb[15].mxu1 }
 0x24b   :  { %v942_v24 = vadd.f32 %v941_v13, %v1593_v11  ;;  %v962_v25 = vrot.slane %v954_v15, 4 }
 0x24c   :  { %v937_v26 = vrot.slane %v936_v18, 2  ;;  %v957_v27 = vadd.f32 %v956_v19, %v953_v10  ;;  %v948_v28 = vadd.f32 %v947_v20, %v1591_v8  ;;  %v968_v29 = vrot.slane %v955_v21, 4 }
 0x24d   :  { %v943_v30 = vrot.slane %v942_v24, 2  ;;  %v963_v31 = vadd.f32 %v962_v25, %v954_v15  ;;  %v1015_v19 = vsub.s32 2, %v1547_v60 }
 0x24e   :  { %v938_v56 = vadd.f32 %v937_v26, %v936_v18  ;;  %v958_v59 = vrot.slane %v957_v27, 2  ;;  %v949_v33 = vrot.slane %v948_v28, 2  ;;  %v969_v34 = vadd.f32 %v968_v29, %v955_v21 }
 0x24f   :  { %v944_v35 = vadd.f32 %v943_v30, %v942_v24  ;;  %v964_v36 = vrot.slane %v963_v31, 2 }
 0x250   :  { %v939_v37 = vrot.slane %v938_v56, 1  ;;  %v959_v38 = vadd.f32 %v958_v59, %v957_v27  ;;  %v950_v39 = vadd.f32 %v949_v33, %v948_v28  ;;  %v970_v40 = vrot.slane %v969_v34, 2 }
 0x251   :  { %v945_v41 = vrot.slane %v944_v35, 1  ;;  %v965_v0 = vadd.f32 %v964_v36, %v963_v31  ;;  %v1030_v28 = vsub.s32 3, %v1547_v60  ;;  %v1048_v33 = vsub.s32 4, %v1547_v60 }
 0x252   :  { %v940_v42 = vadd.f32 %v939_v37, %v938_v56  ;;  %v960_v43 = vrot.slane %v959_v38, 1  ;;  %v951_v44 = vrot.slane %v950_v39, 1  ;;  %v971_v45 = vadd.f32 %v970_v40, %v969_v34 }
 0x253   :  { %v946_v46 = vadd.f32 %v945_v41, %v944_v35  ;;  %v966_v47 = vrot.slane %v965_v0, 1 }
 0x254   :  { %v961_v48 = vadd.f32 %v960_v43, %v959_v38  ;;  %v974_v49 = vmul.f32 0.125, %v940_v42  ;;  %v952_v50 = vadd.f32 %v951_v44, %v950_v39  ;;  %v972_v51 = vrot.slane %v971_v45, 1 }
 0x255   :  { %v967_v52 = vadd.f32 %v966_v47, %v965_v0  ;;  %v975_v53 = vmul.f32 0.125, %v946_v46  ;;  %v1049_v42 = vrot.slane %v1549_v61, %v1048_v33  ;;  %v1053_v44 = vrot.slane %v1551_v62, %v1048_v33 }
 0x256   :  { %v977_v54 = vmul.f32 0.125, %v961_v48  ;;  %v980_v55 = vmul.f32 %v974_v49, %v974_v49  ;;  %v973_v57 = vadd.f32 %v972_v51, %v971_v45  ;;  %v976_v58 = vmul.f32 0.125, %v952_v50 }
 0x257   :  { %v978_v63 = vmul.f32 0.125, %v967_v52  ;;  %v981_v14 = vmul.f32 %v975_v53, %v975_v53  ;;  %v1057_v47 = vrot.slane %v1569_v32, %v1048_v33 }
 0x258   :  { %v983_v1 = vsub.f32 %v977_v54, %v980_v55  ;;  %v979_v2 = vmul.f32 0.125, %v973_v57  ;;  %v982_v3 = vmul.f32 %v976_v58, %v976_v58 }
 0x259   :  { %v984_v4 = vsub.f32 %v978_v63, %v981_v14 }
 0x25a   :  { %v986_v5 = vmax.f32 %v983_v1, 0.0  ;;  %v985_v7 = vsub.f32 %v979_v2, %v982_v3 }
 0x25b   :  { %v987_v9 = vmax.f32 %v984_v4, 0.0 }
 0x25c   :  { %v989_v10 = vadd.f32 1e-05, %v986_v5  ;;  %v988_v12 = vmax.f32 %v985_v7, 0.0 }
 0x25d   :  { %v990_v13 = vadd.f32 1e-05, %v987_v9 }
 0x25e   :  { %1334 = vrsqrt.f32 %v989_v10  ;;  %v991_v15 = vadd.f32 1e-05, %v988_v12 }
 0x25f   :  { %1336 = vrsqrt.f32 %v990_v13 }
 0x260   :  { %1338 = vrsqrt.f32 %v991_v15 }
 0x268   :  { %v1335_v16 = vpop.eup %1334 }
 0x269   :  { %v1337_v17 = vpop.eup %1336  ;;  %v995_v18 = vmul.f32 %v1335_v16, %v1549_v61 }
 0x26a   :  { %v1339_v20 = vpop.eup %1338  ;;  %v996_v21 = vmul.f32 %v1337_v17, %v1551_v62 }
 0x26b   :  { %v998_v22 = vmul.f32 %v995_v18, %v974_v49  ;;  %v997_v23 = vmul.f32 %v1339_v20, %v1569_v32  ;;  %v1016_v26 = vrot.slane %v995_v18, %v1015_v19 }
 0x26c   :  { %v999_v24 = vmul.f32 %v996_v21, %v975_v53  ;;  %v1020_v30 = vrot.slane %v996_v21, %v1015_v19 }
 0x26d   :  { %v1004_v25 = vrot.slane %v998_v22, 7  ;;  %v1000_v27 = vmul.f32 %v997_v23, %v976_v58  ;;  %v1024_v59 = vrot.slane %v997_v23, %v1015_v19  ;;  %v1025_v35 = vmul.f32 %v1016_v26, %v1586_v6 }
 0x26e   :  { %v1005_v29 = vrot.slane %v999_v24, 7  ;;  %v1026_v38 = vmul.f32 %v1020_v30, %v1593_v11 }
 0x26f   :  { %v1006_v31 = vrot.slane %v1000_v27, 7  ;;  %v1010_v56 = vsub.f32 %v1549_v61, %v1004_v25  ;;  %v1027_v40 = vmul.f32 %v1024_v59, %v1591_v8  ;;  %v1067_v8 = vsub.s32 5, %v1547_v60 }
 0x270   :  { %v1011_v34 = vsub.f32 %v1551_v62, %v1005_v29 }
 0x271   :  { %v1012_v36 = vsub.f32 %v1569_v32, %v1006_v31  ;;  %v1031_v37 = vrot.slane %v1010_v56, %v1030_v28  ;;  %v1068_v53 = vrot.slane %v1549_v61, %v1067_v8 }
 0x272   :  { %v1035_v39 = vrot.slane %v1011_v34, %v1030_v28 }
 0x273   :  { %v1039_v41 = vrot.slane %v1012_v36, %v1030_v28  ;;  %v1040_v0 = vadd.f32 %v1031_v37, %v1025_v35 }
 0x274   :  { %v1041_v43 = vadd.f32 %v1035_v39, %v1026_v38 }
 0x275   :  { %v1042_v45 = vadd.f32 %v1039_v41, %v1027_v40  ;;  %v1043_v46 = vmax.f32 %v1040_v0, 0.0 }
 0x276   :  { %v1044_v6 = vmax.f32 %v1041_v43, 0.0 }
 0x277   :  { %v1045_v48 = vmax.f32 %v1042_v45, 0.0  ;;  %v1058_v49 = vmul.f32 %v1049_v42, %v1043_v46 }
 0x278   :  { %v1059_v50 = vmul.f32 %v1053_v44, %v1044_v6 }
 0x279   :  { %v1060_v51 = vmul.f32 %v1057_v47, %v1045_v48 }
 0x27a   :  { %v1061_v11 = vadd.f32 %v1059_v50, %v1058_v49 }
 0x27c   :  { %v1062_v52 = vadd.f32 %v1061_v11, %v1060_v51 }
 0x27e   :  { %1063 = vadd.xlane.f32.xlu0 %v1062_v52 }
 0x30b   :  { %v1064_v54 = vpop.xlane.xlu0 %1063 }
 0x30c   :  { %v1069_v55 = vadd.f32 %v1068_v53, %v1064_v54 }
 0x30e   :  { %1071 = vst.msk [vmem:[%s1628_s4] sm:$0xff] %vm1070_vm2, %v1069_v55 }
 0x30f   :  { %1076 = vsyncpa [#allocation3], 1 }
 0x310   :  { %1077 = vsyncpa [#allocation5], 1 }
 0x311   :  { %1078 = vsyncpa [#allocation8], 1 }

</bundles_post_ra>
